<compile_context>
chip_gen: v6e
topology: v6e:2x2x1
jax: 0.10.0
libtpu: 0.0.40
codegen_flags: <defaults>
</compile_context>

<pallas_src>
import jax
import jax.numpy as jnp
from jax.experimental import pallas as pl
from jax.experimental.pallas import tpu as pltpu


# --------------------------------------------------------------------------- #
# Kernels
# --------------------------------------------------------------------------- #
def _gs_rbf_major_kernel(coeff_ref, dist_ref, offset_ref, out_ref):
    # Lane-dense orientation: RBF index on sublanes, edges on lanes.
    #   coeff_ref:  (1, 1)               SMEM scalar
    #   dist_ref:   (1, TILE_E)          VMEM, lane-dense
    #   offset_ref: (NUM_RBF, 1)         VMEM (same block every step -> resident)
    #   out_ref:    (NUM_RBF, TILE_E)    VMEM -> unmasked vst + dense writeback
    d = dist_ref[...]                     # (1, TILE_E)
    off = offset_ref[...]                 # (NUM_RBF, 1)
    c = coeff_ref[0, 0]
    diff = d - off                        # broadcast -> (NUM_RBF, TILE_E)
    out_ref[...] = jnp.exp(c * (diff * diff)).astype(out_ref.dtype)


def _gs_edge_major_kernel(coeff_ref, dist_ref, offset_ref, out_ref):
    # PyTorch-layout orientation: edges on sublanes, RBF on lanes.
    #   dist_ref:   (TILE_E, 1)
    #   offset_ref: (1, NUM_RBF)
    #   out_ref:    (TILE_E, NUM_RBF)
    d = dist_ref[...]                     # (TILE_E, 1)
    off = offset_ref[...]                 # (1, NUM_RBF)
    c = coeff_ref[0, 0]
    diff = d - off                        # broadcast -> (TILE_E, NUM_RBF)
    out_ref[...] = jnp.exp(c * (diff * diff)).astype(out_ref.dtype)


# --------------------------------------------------------------------------- #
# Tiling helpers
# --------------------------------------------------------------------------- #
def _round_up(x, m):
    return ((x + m - 1) // m) * m


def _split_tiles(e, tile_req, align):
    """Equal-split tiling of `e` rows into `grid` tiles of size `tile`.

    Bounds padding waste to < `align` rows per grid step (instead of up to a
    whole extra tile with e_pad = round_up(E, tile))."""
    e_al = _round_up(max(int(e), 1), align)
    tile_req = max(align, _round_up(int(tile_req), align))
    grid = pl.cdiv(e_al, tile_req)
    tile = _round_up(pl.cdiv(e_al, grid), align)
    return int(grid), int(tile), int(grid) * int(tile)


# --------------------------------------------------------------------------- #
# Wrapper
# --------------------------------------------------------------------------- #
def gaussian_smearing(dist, offset, coeff, *, layout="edge_major", tile_e=None,
                      out_dtype=jnp.float32, out_buffers=None):
    """out[e, r] = exp(coeff * (dist[e] - offset[r])**2).

    dist: (E,), offset: (num_rbf,), coeff: scalar.

    layout:
      "edge_major" (default): returns (E, num_rbf) — matches the PyTorch module.
      "rbf_major":            returns (num_rbf, E) — lane-dense fast path
                              (unmasked stores, dense writeback DMA, no padded-
                              lane exp work); preferred when the consumer can
                              take the transposed activation (e.g. a fused dot).
    tile_e: edges per grid step (auto-clamped to the problem; equal-split).
    out_dtype: jnp.float32 (exact) or jnp.bfloat16 (halves HBM write traffic).
    out_buffers: optional int -> pl.Buffered(n) on the output spec (sweep 2/3).
    """
    E = int(dist.shape[0])
    num_rbf = int(offset.shape[0])

    coeff2d = jnp.asarray(coeff, jnp.float32).reshape(1, 1)
    dist_f32 = dist.astype(jnp.float32)
    offset_f32 = offset.astype(jnp.float32)

    out_spec_kwargs = {} if out_buffers is None else dict(
        pipeline_mode=pl.Buffered(int(out_buffers)))

    if layout == "rbf_major":
        # Lane-dense path: edges live on the 128-wide lane axis.
        tile_req = 8192 if tile_e is None else tile_e
        grid_n, tile, e_pad = _split_tiles(E, tile_req, 128)

        dist2d = dist_f32.reshape(1, E)
        if e_pad != E:
            dist2d = jnp.pad(dist2d, ((0, 0), (0, e_pad - E)))
        offset2d = offset_f32.reshape(num_rbf, 1)

        out = pl.pallas_call(
            _gs_rbf_major_kernel,
            out_shape=jax.ShapeDtypeStruct((num_rbf, e_pad), out_dtype),
            grid=(grid_n,),
            in_specs=[
                pl.BlockSpec(memory_space=pltpu.SMEM),               # coeff
                pl.BlockSpec((1, tile), lambda i: (0, i)),           # dist row
                pl.BlockSpec((num_rbf, 1), lambda i: (0, 0)),        # offsets
            ],
            out_specs=pl.BlockSpec((num_rbf, tile), lambda i: (0, i),
                                   **out_spec_kwargs),
            compiler_params=pltpu.CompilerParams(
                dimension_semantics=("parallel",),                   # 2-TC on v7x
            ),
        )(coeff2d, dist2d, offset2d)

        if e_pad != E:
            out = out[:, :E]
        return out

    if layout != "edge_major":
        raise ValueError(f"unknown layout: {layout!r}")

    # PyTorch-compatible (E, num_rbf) layout.  Sublane packing depends on the
    # output dtype (8 rows/f32, 16 rows/bf16, 32 rows/int8-class).
    itemsize = jnp.dtype(out_dtype).itemsize
    sub = {4: 8, 2: 16, 1: 32}.get(itemsize, 8)
    tile_req = 2048 if tile_e is None else tile_e
    grid_n, tile, e_pad = _split_tiles(E, tile_req, sub)

    dist2d = dist_f32.reshape(E, 1)
    if e_pad != E:
        dist2d = jnp.pad(dist2d, ((0, e_pad - E), (0, 0)))
    offset2d = offset_f32.reshape(1, num_rbf)

    out = pl.pallas_call(
        _gs_edge_major_kernel,
        out_shape=jax.ShapeDtypeStruct((e_pad, num_rbf), out_dtype),
        grid=(grid_n,),
        in_specs=[
            pl.BlockSpec(memory_space=pltpu.SMEM),                   # coeff
            pl.BlockSpec((tile, 1), lambda i: (i, 0)),               # dist col
            pl.BlockSpec((1, num_rbf), lambda i: (0, 0)),            # offsets
        ],
        out_specs=pl.BlockSpec((tile, num_rbf), lambda i: (i, 0),
                               **out_spec_kwargs),
        compiler_params=pltpu.CompilerParams(
            dimension_semantics=("parallel",),
        ),
    )(coeff2d, dist2d, offset2d)

    if e_pad != E:
        out = out[:E]
    return out


def init_gaussian_smearing_params(cutoff_lower=0.0, cutoff_upper=5.0, num_rbf=50):
    # Deterministic init, mirrors GaussianSmearing._initial_params().
    offset = jnp.linspace(cutoff_lower, cutoff_upper, num_rbf, dtype=jnp.float32)
    coeff = -0.5 / (offset[1] - offset[0]) ** 2
    return offset, coeff


if __name__ == "__main__":
    cutoff_lower, cutoff_upper, num_rbf = 0.0, 5.0, 50
    offset, coeff = init_gaussian_smearing_params(cutoff_lower, cutoff_upper, num_rbf)

    # Small deterministic input: E = 300 edge distances (not a multiple of 8 or
    # 128, exercising the equal-split padding path) in [0, cutoff_upper).
    key = jax.random.PRNGKey(0)
    E = 300
    dist = jax.random.uniform(key, (E,), dtype=jnp.float32,
                              minval=cutoff_lower, maxval=cutoff_upper)

    ref = jnp.exp(coeff * (dist[:, None] - offset[None, :]) ** 2)

    # 1) Default PyTorch-compatible layout (E, num_rbf).
    out = jax.block_until_ready(gaussian_smearing(dist, offset, coeff))
    assert out.shape == (E, num_rbf) and out.dtype == jnp.float32
    assert jnp.allclose(out, ref, atol=1e-6, rtol=1e-6)

    # 2) Lane-dense fast path (num_rbf, E) — the recommended layout.
    out_t = jax.block_until_ready(
        gaussian_smearing(dist, offset, coeff, layout="rbf_major"))
    assert out_t.shape == (num_rbf, E) and out_t.dtype == jnp.float32
    assert jnp.allclose(out_t.T, ref, atol=1e-6, rtol=1e-6)

    # 3) Multi-step grids (exercise equal-split tail handling on both layouts).
    out_multi = jax.block_until_ready(
        gaussian_smearing(dist, offset, coeff, tile_e=64))              # grid = 5
    assert jnp.allclose(out_multi, ref, atol=1e-6, rtol=1e-6)
    out_t_multi = jax.block_until_ready(
        gaussian_smearing(dist, offset, coeff, layout="rbf_major",
                          tile_e=128))                                  # grid = 3
    assert jnp.allclose(out_t_multi.T, ref, atol=1e-6, rtol=1e-6)

    # 4) bf16 output halves HBM write traffic (lane-dense + edge-major paths).
    out_bf16_t = jax.block_until_ready(
        gaussian_smearing(dist, offset, coeff, layout="rbf_major",
                          out_dtype=jnp.bfloat16))
    assert out_bf16_t.dtype == jnp.bfloat16
    assert jnp.allclose(out_bf16_t.T.astype(jnp.float32), ref, atol=1e-2, rtol=1e-2)
    out_bf16 = jax.block_until_ready(
        gaussian_smearing(dist, offset, coeff, out_dtype=jnp.bfloat16,
                          tile_e=64))                                   # 16-row tiles
    assert out_bf16.dtype == jnp.bfloat16
    assert jnp.allclose(out_bf16.astype(jnp.float32), ref, atol=1e-2, rtol=1e-2)

    print("KERNEL_OK")
</pallas_src>

<mosaic_0001>
module attributes {stable_mosaic.version = 11 : i64} {
  func.func @_gs_edge_major_kernel(%arg0: i32, %arg1: memref<1x1xf32, #tpu.memory_space<smem>>, %arg2: memref<304x1xf32, #tpu.memory_space<vmem>>, %arg3: memref<1x50xf32, #tpu.memory_space<vmem>>, %arg4: memref<304x50xf32, #tpu.memory_space<vmem>>) attributes {dimension_semantics = [#tpu.dimension_semantics<parallel>], iteration_bounds = array<i64: 1>, scalar_prefetch = 0 : i64, scratch_operands = 0 : i64, tpu.core_type = #tpu.core_type<tc>, window_params = [{transform_indices = @transform_0, window_bounds = array<i64: 1, 1>}, {transform_indices = @transform_1, window_bounds = array<i64: 304, 1>}, {pipeline_mode = #tpu.pipeline_mode<synchronous>, transform_indices = @transform_2, window_bounds = array<i64: 1, 50>}, {transform_indices = @transform_3, window_bounds = array<i64: 304, 50>}]} {
    %c0 = arith.constant 0 : index
    %c0_0 = arith.constant 0 : index
    %0 = vector.load %arg2[%c0, %c0_0] : memref<304x1xf32, #tpu.memory_space<vmem>>, vector<304x1xf32>
    %c0_1 = arith.constant 0 : index
    %c0_2 = arith.constant 0 : index
    %1 = vector.load %arg3[%c0_1, %c0_2] : memref<1x50xf32, #tpu.memory_space<vmem>>, vector<1x50xf32>
    %c0_3 = arith.constant 0 : index
    %c0_4 = arith.constant 0 : index
    %2 = memref.load %arg1[%c0_3, %c0_4] : memref<1x1xf32, #tpu.memory_space<smem>>
    %3 = vector.broadcast %0 : vector<304x1xf32> to vector<304x50xf32>
    %4 = vector.broadcast %1 : vector<1x50xf32> to vector<304x50xf32>
    %5 = arith.subf %3, %4 : vector<304x50xf32>
    %6 = arith.mulf %5, %5 : vector<304x50xf32>
    %7 = vector.broadcast %2 : f32 to vector<304x50xf32>
    %8 = arith.mulf %7, %6 : vector<304x50xf32>
    %9 = math.exp %8 : vector<304x50xf32>
    %c0_5 = arith.constant 0 : index
    %c0_6 = arith.constant 0 : index
    %10 = vector.load %arg4[%c0_5, %c0_6] : memref<304x50xf32, #tpu.memory_space<vmem>>, vector<304x50xf32>
    tpu.vector_store %arg4[%c0_5, %c0_6], %9 {strides = array<i32>} : memref<304x50xf32, #tpu.memory_space<vmem>>, vector<304x50xf32>,
    return
  }
  func.func @transform_0(%arg0: i32) -> (i32, i32) {
    %c0_i32 = arith.constant 0 : i32
    %c0_i32_0 = arith.constant 0 : i32
    %c0_i32_1 = arith.constant 0 : i32
    return %c0_i32, %c0_i32_0 : i32, i32
  }
  func.func @transform_1(%arg0: i32) -> (i32, i32) {
    %c0_i32 = arith.constant 0 : i32
    %c0_i32_0 = arith.constant 0 : i32
    return %arg0, %c0_i32 : i32, i32
  }
  func.func @transform_2(%arg0: i32) -> (i32, i32) {
    %c0_i32 = arith.constant 0 : i32
    %c0_i32_0 = arith.constant 0 : i32
    %c0_i32_1 = arith.constant 0 : i32
    return %c0_i32, %c0_i32_0 : i32, i32
  }
  func.func @transform_3(%arg0: i32) -> (i32, i32) {
    %c0_i32 = arith.constant 0 : i32
    %c0_i32_0 = arith.constant 0 : i32
    return %arg0, %c0_i32 : i32, i32
  }
}

</mosaic_0001>

<bundles_post_ra>
// kernel: tpu_custom_call.1
= control target key start
LH: loop header
LB: loop body
LE: loop exit
PB: predicated region body
PF: predicated region fallthrough
CT: control target
= control target key end

     0   :  { %v565_v0 = vmov 0   ;;  %vm442_vm0 = vcmask 408576   ;;  %s938_s1 = inlined_call_operand.vmem [shape: f32[304,1], index: 1, kind: input, shape index: {}]   ;;  %s939_s2 = inlined_call_operand.vmem [shape: f32[1,50], index: 2, kind: input, shape index: {}]   ;;  %s940_s0 = inlined_call_operand.<no memory space> [shape: f32[1,1], index: 0, kind: input, shape index: {}]   ;;  %s941_s3 = inlined_call_operand.vmem [shape: f32[304,50], index: 3, kind: output, shape index: {}]  }
   0x1   :  { %488 = vset.pattern.permute.xlu1 %v565_v0  ;;  %487 = vset.pattern.permute.xlu0 %v565_v0  ;;  %v17_v1 = vld [vmem:[%s938_s1 + $0x10] sm:$0xff]  ;;  %v15_v2 = vld [vmem:[%s938_s1] sm:$0xff]  ;;  %v18_v3 = vld [vmem:[%s938_s1 + $0x18] sm:$0xff]  ;;  %v710_v44 = vstv %s940_s0 }
   0x2   :  { %67 = vperm.xlu1 %488, %v17_v1   ;;  %57 = vperm.xlu0 %487, %v15_v2   ;;  %v16_v4 = vld [vmem:[%s938_s1 + $0x8] sm:$0xff]  ;;  %v19_v6 = vld [vmem:[%s938_s1 + $0x20] sm:$0xff]  ;;  %v22_v7 = vld [vmem:[%s938_s1 + $0x38] sm:$0xff] }
   0x3   :  { %v20_v5 = vld [vmem:[%s938_s1 + $0x28] sm:$0xff]  ;;  %v21_v8 = vld [vmem:[%s938_s1 + $0x30] sm:$0xff]  ;;  %v23_v10 = vld [vmem:[%s938_s1 + $0x40] sm:$0xff] }
   0x4   :  { %v24_v9 = vld [vmem:[%s938_s1 + $0x48] sm:$0xff]  ;;  %v26_v11 = vld [vmem:[%s938_s1 + $0x58] sm:$0xff]  ;;  %v25_v12 = vld [vmem:[%s938_s1 + $0x50] sm:$0xff] }
   0x5   :  { %v28_v13 = vld [vmem:[%s938_s1 + $0x68] sm:$0xff]  ;;  %v27_v14 = vld [vmem:[%s938_s1 + $0x60] sm:$0xff]  ;;  %v30_v15 = vld [vmem:[%s938_s1 + $0x78] sm:$0xff] }
   0x6   :  { %72 = vperm.xlu1 %488, %v18_v3   ;;  %62 = vperm.xlu0 %487, %v16_v4   ;;  %v29_v16 = vld [vmem:[%s938_s1 + $0x70] sm:$0xff]  ;;  %v32_v17 = vld [vmem:[%s938_s1 + $0x88] sm:$0xff]  ;;  %v31_v18 = vld [vmem:[%s938_s1 + $0x80] sm:$0xff] }
   0x7   :  { %v34_v19 = vld [vmem:[%s938_s1 + $0x98] sm:$0xff]  ;;  %v33_v20 = vld [vmem:[%s938_s1 + $0x90] sm:$0xff]  ;;  %v36_v21 = vld [vmem:[%s938_s1 + $0xa8] sm:$0xff] }
   0x8   :  { %v35_v22 = vld [vmem:[%s938_s1 + $0xa0] sm:$0xff]  ;;  %v38_v23 = vld [vmem:[%s938_s1 + $0xb8] sm:$0xff]  ;;  %v37_v24 = vld [vmem:[%s938_s1 + $0xb0] sm:$0xff] }
   0x9   :  { %v40_v25 = vld [vmem:[%s938_s1 + $0xc8] sm:$0xff]  ;;  %v39_v26 = vld [vmem:[%s938_s1 + $0xc0] sm:$0xff]  ;;  %v42_v27 = vld [vmem:[%s938_s1 + $0xd8] sm:$0xff] }
   0xa   :  { %82 = vperm.xlu1 %488, %v20_v5   ;;  %77 = vperm.xlu0 %487, %v19_v6   ;;  %v41_v28 = vld [vmem:[%s938_s1 + $0xd0] sm:$0xff]  ;;  %v44_v29 = vld [vmem:[%s938_s1 + $0xe8] sm:$0xff]  ;;  %v43_v30 = vld [vmem:[%s938_s1 + $0xe0] sm:$0xff] }
   0xb   :  { %v46_v31 = vld [vmem:[%s938_s1 + $0xf8] sm:$0xff]  ;;  %v45_v32 = vld [vmem:[%s938_s1 + $0xf0] sm:$0xff]  ;;  %v48_v33 = vld [vmem:[%s938_s1 + $0x108] sm:$0xff] }
   0xc   :  { %v47_v34 = vld [vmem:[%s938_s1 + $0x100] sm:$0xff]  ;;  %v50_v35 = vld [vmem:[%s938_s1 + $0x118] sm:$0xff]  ;;  %v49_v36 = vld [vmem:[%s938_s1 + $0x110] sm:$0xff] }
   0xd   :  { %v52_v37 = vld [vmem:[%s938_s1 + $0x128] sm:$0xff]  ;;  %v51_v38 = vld [vmem:[%s938_s1 + $0x120] sm:$0xff] }
   0xe   :  { %92 = vperm.xlu1 %488, %v22_v7   ;;  %87 = vperm.xlu0 %487, %v21_v8   ;;  %v703_v39 = vld [vmem:[%s939_s2] ss:$0 sm:$0xff] }
  0x12   :  { %102 = vperm.xlu1 %488, %v24_v9   ;;  %97 = vperm.xlu0 %487, %v23_v10  }
  0x16   :  { %112 = vperm.xlu1 %488, %v26_v11   ;;  %107 = vperm.xlu0 %487, %v25_v12  }
  0x1a   :  { %122 = vperm.xlu1 %488, %v28_v13   ;;  %117 = vperm.xlu0 %487, %v27_v14  }
  0x1e   :  { %132 = vperm.xlu1 %488, %v30_v15   ;;  %127 = vperm.xlu0 %487, %v29_v16  }
  0x22   :  { %142 = vperm.xlu1 %488, %v32_v17   ;;  %137 = vperm.xlu0 %487, %v31_v18  }
  0x26   :  { %152 = vperm.xlu1 %488, %v34_v19   ;;  %147 = vperm.xlu0 %487, %v33_v20  }
  0x2a   :  { %162 = vperm.xlu1 %488, %v36_v21   ;;  %157 = vperm.xlu0 %487, %v35_v22  }
  0x2e   :  { %172 = vperm.xlu1 %488, %v38_v23   ;;  %167 = vperm.xlu0 %487, %v37_v24  }
  0x32   :  { %182 = vperm.xlu1 %488, %v40_v25   ;;  %177 = vperm.xlu0 %487, %v39_v26  }
  0x36   :  { %192 = vperm.xlu1 %488, %v42_v27   ;;  %187 = vperm.xlu0 %487, %v41_v28  }
  0x3a   :  { %202 = vperm.xlu1 %488, %v44_v29   ;;  %197 = vperm.xlu0 %487, %v43_v30  }
  0x3e   :  { %212 = vperm.xlu1 %488, %v46_v31   ;;  %207 = vperm.xlu0 %487, %v45_v32  }
  0x42   :  { %222 = vperm.xlu1 %488, %v48_v33   ;;  %217 = vperm.xlu0 %487, %v47_v34  }
  0x46   :  { %232 = vperm.xlu1 %488, %v50_v35   ;;  %227 = vperm.xlu0 %487, %v49_v36  }
  0x4a   :  { %242 = vperm.xlu1 %488, %v52_v37   ;;  %237 = vperm.xlu0 %487, %v51_v38  }
  0x7d   :  { %v68_v40 = vpop.permute.xlu1 %67  ;;  %v58_v41 = vpop.permute.xlu0 %57 }
  0x7e   :  { %v253_v42 = vsub.f32 %v68_v40, %v703_v39  ;;  %v251_v43 = vsub.f32 %v58_v41, %v703_v39 }
  0x80   :  { %v291_v45 = vmul.f32 %v253_v42, %v253_v42  ;;  %v289_v46 = vmul.f32 %v251_v43, %v251_v43 }
  0x81   :  { %v73_v47 = vpop.permute.xlu1 %72  ;;  %v63_v48 = vpop.permute.xlu0 %62 }
  0x82   :  { %v330_v49 = vmul.f32 %v710_v44, %v291_v45  ;;  %v328_v50 = vmul.f32 %v710_v44, %v289_v46  ;;  %v254_v51 = vsub.f32 %v73_v47, %v703_v39  ;;  %v252_v52 = vsub.f32 %v63_v48, %v703_v39 }
  0x84   :  { %v370_v53 = vmul.f32 1.442695, %v330_v49  ;;  %v366_v54 = vmul.f32 1.442695, %v328_v50  ;;  %v292_v55 = vmul.f32 %v254_v51, %v254_v51  ;;  %v290_v56 = vmul.f32 %v252_v52, %v252_v52 }
  0x85   :  { %v83_v57 = vpop.permute.xlu1 %82  ;;  %v78_v58 = vpop.permute.xlu0 %77 }
  0x86   :  { %489 = vpow2.f32 %v370_v53  ;;  %v331_v59 = vmul.f32 %v710_v44, %v292_v55  ;;  %v329_v60 = vmul.f32 %v710_v44, %v290_v56  ;;  %v256_v61 = vsub.f32 %v83_v57, %v703_v39 }
  0x87   :  { %491 = vpow2.f32 %v366_v54  ;;  %v255_v62 = vsub.f32 %v78_v58, %v703_v39 }
  0x88   :  { %v372_v63 = vmul.f32 1.442695, %v331_v59  ;;  %v368_v0 = vmul.f32 1.442695, %v329_v60  ;;  %v294_v1 = vmul.f32 %v256_v61, %v256_v61 }
  0x89   :  { %v293_v2 = vmul.f32 %v255_v62, %v255_v62  ;;  %v93_v3 = vpop.permute.xlu1 %92  ;;  %v88_v4 = vpop.permute.xlu0 %87 }
  0x8a   :  { %493 = vpow2.f32 %v372_v63  ;;  %v333_v5 = vmul.f32 %v710_v44, %v294_v1  ;;  %v258_v6 = vsub.f32 %v93_v3, %v703_v39  ;;  %v257_v7 = vsub.f32 %v88_v4, %v703_v39 }
  0x8b   :  { %495 = vpow2.f32 %v368_v0  ;;  %v332_v8 = vmul.f32 %v710_v44, %v293_v2 }
  0x8c   :  { %v376_v9 = vmul.f32 1.442695, %v333_v5  ;;  %v296_v10 = vmul.f32 %v258_v6, %v258_v6  ;;  %v295_v11 = vmul.f32 %v257_v7, %v257_v7 }
  0x8d   :  { %v374_v12 = vmul.f32 1.442695, %v332_v8  ;;  %v103_v13 = vpop.permute.xlu1 %102  ;;  %v98_v14 = vpop.permute.xlu0 %97 }
  0x8e   :  { %497 = vpow2.f32 %v376_v9  ;;  %v335_v15 = vmul.f32 %v710_v44, %v296_v10  ;;  %v334_v16 = vmul.f32 %v710_v44, %v295_v11  ;;  %v260_v17 = vsub.f32 %v103_v13, %v703_v39 }
  0x8f   :  { %499 = vpow2.f32 %v374_v12  ;;  %v259_v18 = vsub.f32 %v98_v14, %v703_v39 }
  0x90   :  { %v380_v19 = vmul.f32 1.442695, %v335_v15  ;;  %v378_v20 = vmul.f32 1.442695, %v334_v16  ;;  %v298_v21 = vmul.f32 %v260_v17, %v260_v17 }
  0x91   :  { %v297_v22 = vmul.f32 %v259_v18, %v259_v18  ;;  %v113_v23 = vpop.permute.xlu1 %112  ;;  %v108_v24 = vpop.permute.xlu0 %107 }
  0x92   :  { %501 = vpow2.f32 %v380_v19  ;;  %v337_v25 = vmul.f32 %v710_v44, %v298_v21  ;;  %v262_v26 = vsub.f32 %v113_v23, %v703_v39  ;;  %v261_v27 = vsub.f32 %v108_v24, %v703_v39 }
  0x93   :  { %v490_v28 = vpop.eup %489  ;;  %503 = vpow2.f32 %v378_v20  ;;  %v336_v29 = vmul.f32 %v710_v44, %v297_v22 }
  0x94   :  { %v492_v30 = vpop.eup %491  ;;  %445 = vst.msk [vmem:[%s941_s3 + $0x10] sm:$0xff] %vm442_vm0, %v490_v28  ;;  %v384_v31 = vmul.f32 1.442695, %v337_v25  ;;  %v300_v32 = vmul.f32 %v262_v26, %v262_v26  ;;  %v299_v33 = vmul.f32 %v261_v27, %v261_v27 }
  0x95   :  { %443 = vst.msk [vmem:[%s941_s3] sm:$0xff] %vm442_vm0, %v492_v30  ;;  %v382_v34 = vmul.f32 1.442695, %v336_v29  ;;  %v123_v35 = vpop.permute.xlu1 %122  ;;  %v118_v36 = vpop.permute.xlu0 %117 }
  0x96   :  { %505 = vpow2.f32 %v384_v31  ;;  %v339_v37 = vmul.f32 %v710_v44, %v300_v32  ;;  %v338_v38 = vmul.f32 %v710_v44, %v299_v33  ;;  %v264_v40 = vsub.f32 %v123_v35, %v703_v39 }
  0x97   :  { %v494_v41 = vpop.eup %493  ;;  %507 = vpow2.f32 %v382_v34  ;;  %v263_v42 = vsub.f32 %v118_v36, %v703_v39 }
  0x98   :  { %v496_v43 = vpop.eup %495  ;;  %446 = vst.msk [vmem:[%s941_s3 + $0x18] sm:$0xff] %vm442_vm0, %v494_v41  ;;  %v388_v45 = vmul.f32 1.442695, %v339_v37  ;;  %v386_v46 = vmul.f32 1.442695, %v338_v38  ;;  %v302_v47 = vmul.f32 %v264_v40, %v264_v40 }
  0x99   :  { %444 = vst.msk [vmem:[%s941_s3 + $0x8] sm:$0xff] %vm442_vm0, %v496_v43  ;;  %v301_v48 = vmul.f32 %v263_v42, %v263_v42  ;;  %v133_v49 = vpop.permute.xlu1 %132  ;;  %v128_v50 = vpop.permute.xlu0 %127 }
  0x9a   :  { %509 = vpow2.f32 %v388_v45  ;;  %v341_v51 = vmul.f32 %v710_v44, %v302_v47  ;;  %v266_v52 = vsub.f32 %v133_v49, %v703_v39  ;;  %v265_v53 = vsub.f32 %v128_v50, %v703_v39 }
  0x9b   :  { %v498_v54 = vpop.eup %497  ;;  %511 = vpow2.f32 %v386_v46  ;;  %v340_v55 = vmul.f32 %v710_v44, %v301_v48 }
  0x9c   :  { %v500_v56 = vpop.eup %499  ;;  %448 = vst.msk [vmem:[%s941_s3 + $0x28] sm:$0xff] %vm442_vm0, %v498_v54  ;;  %v392_v57 = vmul.f32 1.442695, %v341_v51  ;;  %v304_v58 = vmul.f32 %v266_v52, %v266_v52  ;;  %v303_v59 = vmul.f32 %v265_v53, %v265_v53 }
  0x9d   :  { %447 = vst.msk [vmem:[%s941_s3 + $0x20] sm:$0xff] %vm442_vm0, %v500_v56  ;;  %v390_v60 = vmul.f32 1.442695, %v340_v55  ;;  %v143_v61 = vpop.permute.xlu1 %142  ;;  %v138_v62 = vpop.permute.xlu0 %137 }
  0x9e   :  { %513 = vpow2.f32 %v392_v57  ;;  %v343_v63 = vmul.f32 %v710_v44, %v304_v58  ;;  %v342_v0 = vmul.f32 %v710_v44, %v303_v59  ;;  %v268_v1 = vsub.f32 %v143_v61, %v703_v39 }
  0x9f   :  { %v502_v2 = vpop.eup %501  ;;  %515 = vpow2.f32 %v390_v60  ;;  %v267_v3 = vsub.f32 %v138_v62, %v703_v39 }
  0xa0   :  { %v504_v4 = vpop.eup %503  ;;  %450 = vst.msk [vmem:[%s941_s3 + $0x38] sm:$0xff] %vm442_vm0, %v502_v2  ;;  %v396_v5 = vmul.f32 1.442695, %v343_v63  ;;  %v394_v6 = vmul.f32 1.442695, %v342_v0  ;;  %v306_v7 = vmul.f32 %v268_v1, %v268_v1 }
  0xa1   :  { %449 = vst.msk [vmem:[%s941_s3 + $0x30] sm:$0xff] %vm442_vm0, %v504_v4  ;;  %v305_v8 = vmul.f32 %v267_v3, %v267_v3  ;;  %v153_v9 = vpop.permute.xlu1 %152  ;;  %v148_v10 = vpop.permute.xlu0 %147 }
  0xa2   :  { %517 = vpow2.f32 %v396_v5  ;;  %v345_v11 = vmul.f32 %v710_v44, %v306_v7  ;;  %v270_v12 = vsub.f32 %v153_v9, %v703_v39  ;;  %v269_v13 = vsub.f32 %v148_v10, %v703_v39 }
  0xa3   :  { %v506_v14 = vpop.eup %505  ;;  %519 = vpow2.f32 %v394_v6  ;;  %v344_v15 = vmul.f32 %v710_v44, %v305_v8 }
  0xa4   :  { %v508_v16 = vpop.eup %507  ;;  %452 = vst.msk [vmem:[%s941_s3 + $0x48] sm:$0xff] %vm442_vm0, %v506_v14  ;;  %v400_v17 = vmul.f32 1.442695, %v345_v11  ;;  %v308_v18 = vmul.f32 %v270_v12, %v270_v12  ;;  %v307_v19 = vmul.f32 %v269_v13, %v269_v13 }
  0xa5   :  { %451 = vst.msk [vmem:[%s941_s3 + $0x40] sm:$0xff] %vm442_vm0, %v508_v16  ;;  %v398_v20 = vmul.f32 1.442695, %v344_v15  ;;  %v163_v21 = vpop.permute.xlu1 %162  ;;  %v158_v22 = vpop.permute.xlu0 %157 }
  0xa6   :  { %521 = vpow2.f32 %v400_v17  ;;  %v347_v23 = vmul.f32 %v710_v44, %v308_v18  ;;  %v346_v24 = vmul.f32 %v710_v44, %v307_v19  ;;  %v272_v25 = vsub.f32 %v163_v21, %v703_v39 }
  0xa7   :  { %v510_v26 = vpop.eup %509  ;;  %523 = vpow2.f32 %v398_v20  ;;  %v271_v27 = vsub.f32 %v158_v22, %v703_v39 }
  0xa8   :  { %v512_v28 = vpop.eup %511  ;;  %454 = vst.msk [vmem:[%s941_s3 + $0x58] sm:$0xff] %vm442_vm0, %v510_v26  ;;  %v404_v29 = vmul.f32 1.442695, %v347_v23  ;;  %v402_v30 = vmul.f32 1.442695, %v346_v24  ;;  %v310_v31 = vmul.f32 %v272_v25, %v272_v25 }
  0xa9   :  { %453 = vst.msk [vmem:[%s941_s3 + $0x50] sm:$0xff] %vm442_vm0, %v512_v28  ;;  %v309_v32 = vmul.f32 %v271_v27, %v271_v27  ;;  %v173_v33 = vpop.permute.xlu1 %172  ;;  %v168_v34 = vpop.permute.xlu0 %167 }
  0xaa   :  { %525 = vpow2.f32 %v404_v29  ;;  %v349_v35 = vmul.f32 %v710_v44, %v310_v31  ;;  %v274_v36 = vsub.f32 %v173_v33, %v703_v39  ;;  %v273_v37 = vsub.f32 %v168_v34, %v703_v39 }
  0xab   :  { %v514_v38 = vpop.eup %513  ;;  %527 = vpow2.f32 %v402_v30  ;;  %v348_v40 = vmul.f32 %v710_v44, %v309_v32 }
  0xac   :  { %v516_v41 = vpop.eup %515  ;;  %456 = vst.msk [vmem:[%s941_s3 + $0x68] sm:$0xff] %vm442_vm0, %v514_v38  ;;  %v408_v42 = vmul.f32 1.442695, %v349_v35  ;;  %v312_v43 = vmul.f32 %v274_v36, %v274_v36  ;;  %v311_v45 = vmul.f32 %v273_v37, %v273_v37 }
  0xad   :  { %455 = vst.msk [vmem:[%s941_s3 + $0x60] sm:$0xff] %vm442_vm0, %v516_v41  ;;  %v406_v46 = vmul.f32 1.442695, %v348_v40  ;;  %v183_v47 = vpop.permute.xlu1 %182  ;;  %v178_v48 = vpop.permute.xlu0 %177 }
  0xae   :  { %529 = vpow2.f32 %v408_v42  ;;  %v351_v49 = vmul.f32 %v710_v44, %v312_v43  ;;  %v350_v50 = vmul.f32 %v710_v44, %v311_v45  ;;  %v276_v51 = vsub.f32 %v183_v47, %v703_v39 }
  0xaf   :  { %v518_v52 = vpop.eup %517  ;;  %531 = vpow2.f32 %v406_v46  ;;  %v275_v53 = vsub.f32 %v178_v48, %v703_v39 }
  0xb0   :  { %v520_v54 = vpop.eup %519  ;;  %458 = vst.msk [vmem:[%s941_s3 + $0x78] sm:$0xff] %vm442_vm0, %v518_v52  ;;  %v412_v55 = vmul.f32 1.442695, %v351_v49  ;;  %v410_v56 = vmul.f32 1.442695, %v350_v50  ;;  %v314_v57 = vmul.f32 %v276_v51, %v276_v51 }
  0xb1   :  { %457 = vst.msk [vmem:[%s941_s3 + $0x70] sm:$0xff] %vm442_vm0, %v520_v54  ;;  %v313_v58 = vmul.f32 %v275_v53, %v275_v53  ;;  %v193_v59 = vpop.permute.xlu1 %192  ;;  %v188_v60 = vpop.permute.xlu0 %187 }
  0xb2   :  { %533 = vpow2.f32 %v412_v55  ;;  %v353_v61 = vmul.f32 %v710_v44, %v314_v57  ;;  %v278_v62 = vsub.f32 %v193_v59, %v703_v39  ;;  %v277_v63 = vsub.f32 %v188_v60, %v703_v39 }
  0xb3   :  { %v522_v0 = vpop.eup %521  ;;  %535 = vpow2.f32 %v410_v56  ;;  %v352_v1 = vmul.f32 %v710_v44, %v313_v58 }
  0xb4   :  { %v524_v2 = vpop.eup %523  ;;  %460 = vst.msk [vmem:[%s941_s3 + $0x88] sm:$0xff] %vm442_vm0, %v522_v0  ;;  %v416_v3 = vmul.f32 1.442695, %v353_v61  ;;  %v316_v4 = vmul.f32 %v278_v62, %v278_v62  ;;  %v315_v5 = vmul.f32 %v277_v63, %v277_v63 }
  0xb5   :  { %459 = vst.msk [vmem:[%s941_s3 + $0x80] sm:$0xff] %vm442_vm0, %v524_v2  ;;  %v414_v6 = vmul.f32 1.442695, %v352_v1  ;;  %v203_v7 = vpop.permute.xlu1 %202  ;;  %v198_v8 = vpop.permute.xlu0 %197 }
  0xb6   :  { %537 = vpow2.f32 %v416_v3  ;;  %v355_v9 = vmul.f32 %v710_v44, %v316_v4  ;;  %v354_v10 = vmul.f32 %v710_v44, %v315_v5  ;;  %v280_v11 = vsub.f32 %v203_v7, %v703_v39 }
  0xb7   :  { %v526_v12 = vpop.eup %525  ;;  %539 = vpow2.f32 %v414_v6  ;;  %v279_v13 = vsub.f32 %v198_v8, %v703_v39 }
  0xb8   :  { %v528_v14 = vpop.eup %527  ;;  %462 = vst.msk [vmem:[%s941_s3 + $0x98] sm:$0xff] %vm442_vm0, %v526_v12  ;;  %v420_v15 = vmul.f32 1.442695, %v355_v9  ;;  %v418_v16 = vmul.f32 1.442695, %v354_v10  ;;  %v318_v17 = vmul.f32 %v280_v11, %v280_v11 }
  0xb9   :  { %461 = vst.msk [vmem:[%s941_s3 + $0x90] sm:$0xff] %vm442_vm0, %v528_v14  ;;  %v317_v18 = vmul.f32 %v279_v13, %v279_v13  ;;  %v213_v19 = vpop.permute.xlu1 %212  ;;  %v208_v20 = vpop.permute.xlu0 %207 }
  0xba   :  { %541 = vpow2.f32 %v420_v15  ;;  %v357_v21 = vmul.f32 %v710_v44, %v318_v17  ;;  %v282_v22 = vsub.f32 %v213_v19, %v703_v39  ;;  %v281_v23 = vsub.f32 %v208_v20, %v703_v39 }
  0xbb   :  { %v530_v24 = vpop.eup %529  ;;  %543 = vpow2.f32 %v418_v16  ;;  %v356_v25 = vmul.f32 %v710_v44, %v317_v18 }
  0xbc   :  { %v532_v26 = vpop.eup %531  ;;  %464 = vst.msk [vmem:[%s941_s3 + $0xa8] sm:$0xff] %vm442_vm0, %v530_v24  ;;  %v424_v27 = vmul.f32 1.442695, %v357_v21  ;;  %v320_v28 = vmul.f32 %v282_v22, %v282_v22  ;;  %v319_v29 = vmul.f32 %v281_v23, %v281_v23 }
  0xbd   :  { %463 = vst.msk [vmem:[%s941_s3 + $0xa0] sm:$0xff] %vm442_vm0, %v532_v26  ;;  %v422_v30 = vmul.f32 1.442695, %v356_v25  ;;  %v223_v31 = vpop.permute.xlu1 %222  ;;  %v218_v32 = vpop.permute.xlu0 %217 }
  0xbe   :  { %545 = vpow2.f32 %v424_v27  ;;  %v359_v33 = vmul.f32 %v710_v44, %v320_v28  ;;  %v358_v34 = vmul.f32 %v710_v44, %v319_v29  ;;  %v284_v35 = vsub.f32 %v223_v31, %v703_v39 }
  0xbf   :  { %v534_v36 = vpop.eup %533  ;;  %547 = vpow2.f32 %v422_v30  ;;  %v283_v37 = vsub.f32 %v218_v32, %v703_v39 }
  0xc0   :  { %v536_v38 = vpop.eup %535  ;;  %466 = vst.msk [vmem:[%s941_s3 + $0xb8] sm:$0xff] %vm442_vm0, %v534_v36  ;;  %v428_v40 = vmul.f32 1.442695, %v359_v33  ;;  %v426_v41 = vmul.f32 1.442695, %v358_v34  ;;  %v322_v42 = vmul.f32 %v284_v35, %v284_v35 }
  0xc1   :  { %465 = vst.msk [vmem:[%s941_s3 + $0xb0] sm:$0xff] %vm442_vm0, %v536_v38  ;;  %v321_v43 = vmul.f32 %v283_v37, %v283_v37  ;;  %v233_v45 = vpop.permute.xlu1 %232  ;;  %v228_v46 = vpop.permute.xlu0 %227 }
  0xc2   :  { %549 = vpow2.f32 %v428_v40  ;;  %v361_v47 = vmul.f32 %v710_v44, %v322_v42  ;;  %v286_v48 = vsub.f32 %v233_v45, %v703_v39  ;;  %v285_v49 = vsub.f32 %v228_v46, %v703_v39 }
  0xc3   :  { %v538_v50 = vpop.eup %537  ;;  %551 = vpow2.f32 %v426_v41  ;;  %v360_v51 = vmul.f32 %v710_v44, %v321_v43 }
  0xc4   :  { %v540_v52 = vpop.eup %539  ;;  %468 = vst.msk [vmem:[%s941_s3 + $0xc8] sm:$0xff] %vm442_vm0, %v538_v50  ;;  %v432_v53 = vmul.f32 1.442695, %v361_v47  ;;  %v324_v54 = vmul.f32 %v286_v48, %v286_v48  ;;  %v323_v55 = vmul.f32 %v285_v49, %v285_v49 }
  0xc5   :  { %467 = vst.msk [vmem:[%s941_s3 + $0xc0] sm:$0xff] %vm442_vm0, %v540_v52  ;;  %v430_v56 = vmul.f32 1.442695, %v360_v51  ;;  %v243_v57 = vpop.permute.xlu1 %242  ;;  %v238_v58 = vpop.permute.xlu0 %237 }
  0xc6   :  { %553 = vpow2.f32 %v432_v53  ;;  %v363_v59 = vmul.f32 %v710_v44, %v324_v54  ;;  %v362_v60 = vmul.f32 %v710_v44, %v323_v55  ;;  %v288_v61 = vsub.f32 %v243_v57, %v703_v39 }
  0xc7   :  { %v542_v62 = vpop.eup %541  ;;  %555 = vpow2.f32 %v430_v56  ;;  %v287_v63 = vsub.f32 %v238_v58, %v703_v39 }
  0xc8   :  { %v544_v0 = vpop.eup %543  ;;  %470 = vst.msk [vmem:[%s941_s3 + $0xd8] sm:$0xff] %vm442_vm0, %v542_v62  ;;  %v436_v1 = vmul.f32 1.442695, %v363_v59  ;;  %v434_v2 = vmul.f32 1.442695, %v362_v60  ;;  %v326_v3 = vmul.f32 %v288_v61, %v288_v61 }
  0xc9   :  { %469 = vst.msk [vmem:[%s941_s3 + $0xd0] sm:$0xff] %vm442_vm0, %v544_v0  ;;  %v325_v4 = vmul.f32 %v287_v63, %v287_v63 }
  0xca   :  { %557 = vpow2.f32 %v436_v1  ;;  %v365_v5 = vmul.f32 %v710_v44, %v326_v3 }
  0xcb   :  { %v546_v6 = vpop.eup %545  ;;  %559 = vpow2.f32 %v434_v2  ;;  %v364_v39 = vmul.f32 %v710_v44, %v325_v4 }
  0xcc   :  { %v548_v7 = vpop.eup %547  ;;  %472 = vst.msk [vmem:[%s941_s3 + $0xe8] sm:$0xff] %vm442_vm0, %v546_v6  ;;  %v440_v8 = vmul.f32 1.442695, %v365_v5 }
  0xcd   :  { %471 = vst.msk [vmem:[%s941_s3 + $0xe0] sm:$0xff] %vm442_vm0, %v548_v7  ;;  %v438_v9 = vmul.f32 1.442695, %v364_v39 }
  0xce   :  { %561 = vpow2.f32 %v440_v8 }
  0xcf   :  { %v550_v10 = vpop.eup %549  ;;  %563 = vpow2.f32 %v438_v9 }
  0xd0   :  { %v552_v11 = vpop.eup %551  ;;  %474 = vst.msk [vmem:[%s941_s3 + $0xf8] sm:$0xff] %vm442_vm0, %v550_v10 }
  0xd1   :  { %473 = vst.msk [vmem:[%s941_s3 + $0xf0] sm:$0xff] %vm442_vm0, %v552_v11 }
  0xd3   :  { %v554_v44 = vpop.eup %553 }
  0xd4   :  { %v556_v12 = vpop.eup %555  ;;  %476 = vst.msk [vmem:[%s941_s3 + $0x108] sm:$0xff] %vm442_vm0, %v554_v44 }
  0xd5   :  { %475 = vst.msk [vmem:[%s941_s3 + $0x100] sm:$0xff] %vm442_vm0, %v556_v12 }
  0xd7   :  { %v558_v13 = vpop.eup %557 }
  0xd8   :  { %v560_v14 = vpop.eup %559  ;;  %478 = vst.msk [vmem:[%s941_s3 + $0x118] sm:$0xff] %vm442_vm0, %v558_v13 }
  0xd9   :  { %477 = vst.msk [vmem:[%s941_s3 + $0x110] sm:$0xff] %vm442_vm0, %v560_v14 }
  0xdb   :  { %v562_v15 = vpop.eup %561 }
  0xdc   :  { %v564_v16 = vpop.eup %563  ;;  %480 = vst.msk [vmem:[%s941_s3 + $0x128] sm:$0xff] %vm442_vm0, %v562_v15 }
  0xdd   :  { %479 = vst.msk [vmem:[%s941_s3 + $0x120] sm:$0xff] %vm442_vm0, %v564_v16 }

</bundles_post_ra>
